<compile_context>
chip_gen: v7x
topology: tpu7x:2x2x1
jax: 0.10.0
libtpu: 0.0.40
codegen_flags: <defaults>
</compile_context>

<pallas_src>
import jax
import jax.numpy as jnp
from jax.experimental import pallas as pl
from jax.experimental.pallas import tpu as pltpu


def _round_up(x, m):
    return (x + m - 1) // m * m


def _pick_batch_tile(B):
    # One tile for small batches (block == full dim is always legal, even if B
    # is not a multiple of 8). For large batches stream 256-row tiles (multiple
    # of the f32 sublane count 8); ragged tails are handled by pl.cdiv.
    return B if B <= 256 else 256


def autoencoder_kernel(x_ref, we_ref, be_ref, wd_ref, bd_ref, o_ref):
    # x_ref:  [TB, Dp]  f32 flattened input tile (streams per grid step)
    # we_ref: [Dp, Fp]  bf16 encoder weight (resident in VMEM)
    # be_ref: [1,  Fp]  f32 encoder bias
    # wd_ref: [Fp, Dp]  bf16 decoder weight (resident in VMEM)
    # bd_ref: [1,  Dp]  f32 decoder bias
    # o_ref:  [TB, Dp]  f32 reconstructed output tile
    x = x_ref[...].astype(jnp.bfloat16)

    # Encoder: Linear + sigmoid (bf16 operands on the MXU, f32 accumulation).
    z = jnp.dot(x, we_ref[...], preferred_element_type=jnp.float32) + be_ref[...]
    feat = jax.nn.sigmoid(z)

    # Decoder: Linear + sigmoid (latent never leaves VMEM).
    y = jnp.dot(feat.astype(jnp.bfloat16), wd_ref[...],
                preferred_element_type=jnp.float32) + bd_ref[...]
    o_ref[...] = jax.nn.sigmoid(y).astype(o_ref.dtype)


def autoencoder_forward(x_nchw, w_enc, b_enc, w_dec, b_dec):
    B, C, H, W = x_nchw.shape
    D = C * H * W
    F = w_enc.shape[1]
    x_flat = x_nchw.reshape(B, D)  # matches torch .view(B, -1)

    # Lane-density guard: keep the last (lane) dim of every blocked operand a
    # multiple of 128. Zero padding keeps the math exact for the valid region.
    Dp = _round_up(D, 128)
    Fp = _round_up(F, 128)
    if Dp != D:
        x_flat = jnp.pad(x_flat, ((0, 0), (0, Dp - D)))
    w_enc_p = jnp.pad(w_enc, ((0, Dp - D), (0, Fp - F))).astype(jnp.bfloat16)
    w_dec_p = jnp.pad(w_dec, ((0, Fp - F), (0, Dp - D))).astype(jnp.bfloat16)
    b_enc_p = jnp.pad(b_enc, ((0, 0), (0, Fp - F))).astype(jnp.float32)
    b_dec_p = jnp.pad(b_dec, ((0, 0), (0, Dp - D))).astype(jnp.float32)

    tb = _pick_batch_tile(B)
    grid = (pl.cdiv(B, tb),)

    itemsize = jnp.dtype(x_flat.dtype).itemsize
    # VMEM budget: double-buffered x / out tiles + resident bf16 weights
    # (budget 2 buffers each for safety) + biases.
    vmem_bytes = (
        2 * tb * Dp * itemsize                       # x tiles
        + 2 * tb * Dp * itemsize                     # out tiles
        + 2 * (Dp * Fp + Fp * Dp) * 2                # bf16 weights
        + 2 * (Fp + Dp) * 4                          # biases
    )
    vmem_limit = int(min(vmem_bytes + (8 << 20), 64 << 20))  # <= v7x physical

    cost = pl.CostEstimate(
        flops=4 * B * Dp * Fp,                       # two matmuls
        transcendentals=B * (Fp + Dp),               # two sigmoids
        bytes_accessed=(x_flat.size * itemsize + B * Dp * itemsize
                        + w_enc_p.size * 2 + w_dec_p.size * 2
                        + b_enc_p.size * 4 + b_dec_p.size * 4),
    )

    out_flat = pl.pallas_call(
        autoencoder_kernel,
        out_shape=jax.ShapeDtypeStruct((B, Dp), x_flat.dtype),
        grid_spec=pltpu.PrefetchScalarGridSpec(
            num_scalar_prefetch=0,
            grid=grid,
            in_specs=[
                pl.BlockSpec((tb, Dp), lambda i: (i, 0)),   # x: streams per tile
                pl.BlockSpec((Dp, Fp), lambda i: (0, 0)),   # w_enc: resident
                pl.BlockSpec((1, Fp), lambda i: (0, 0)),    # b_enc: resident
                pl.BlockSpec((Fp, Dp), lambda i: (0, 0)),   # w_dec: resident
                pl.BlockSpec((1, Dp), lambda i: (0, 0)),    # b_dec: resident
            ],
            out_specs=pl.BlockSpec((tb, Dp), lambda i: (i, 0)),
        ),
        compiler_params=pltpu.CompilerParams(
            dimension_semantics=("parallel",),   # shard batch tiles across TCs (v7x)
            vmem_limit_bytes=vmem_limit,
        ),
        cost_estimate=cost,
    )(x_flat, w_enc_p, b_enc_p, w_dec_p, b_dec_p)

    if Dp != D:
        out_flat = out_flat[:, :D]
    return out_flat.reshape(B, C, H, W)


def reference_forward(x_nchw, w_enc, b_enc, w_dec, b_dec):
    # Pure-JAX reference with the same numeric recipe (bf16 weights, f32 accum).
    B, C, H, W = x_nchw.shape
    x = x_nchw.reshape(B, -1)
    z = jnp.dot(x.astype(jnp.bfloat16), w_enc.astype(jnp.bfloat16),
                preferred_element_type=jnp.float32) + b_enc
    feat = jax.nn.sigmoid(z)
    y = jnp.dot(feat.astype(jnp.bfloat16), w_dec.astype(jnp.bfloat16),
                preferred_element_type=jnp.float32) + b_dec
    return jax.nn.sigmoid(y).reshape(B, C, H, W)


def init_params(key, in_dim, feedback_bits):
    # Deterministic xavier-normal-style init (matches xavier_normal_ statistics).
    k_we, k_wd = jax.random.split(key, 2)
    std_e = (2.0 / (in_dim + feedback_bits)) ** 0.5
    std_d = (2.0 / (feedback_bits + in_dim)) ** 0.5
    w_enc = jax.random.normal(k_we, (in_dim, feedback_bits), jnp.float32) * std_e
    w_dec = jax.random.normal(k_wd, (feedback_bits, in_dim), jnp.float32) * std_d
    b_enc = jnp.zeros((1, feedback_bits), jnp.float32)
    b_dec = jnp.zeros((1, in_dim), jnp.float32)
    return w_enc, b_enc, w_dec, b_dec


if __name__ == "__main__":
    key = jax.random.PRNGKey(0)
    k_x, k_p = jax.random.split(key)

    # Small shapes: batch=2, channels=4, spatial=16x16, feedback_bits=128
    B, C, H, W = 2, 4, 16, 16
    feedback_bits = 128
    in_dim = C * H * W

    x = jax.random.uniform(k_x, (B, C, H, W), jnp.float32)
    w_enc, b_enc, w_dec, b_dec = init_params(k_p, in_dim, feedback_bits)

    out = autoencoder_forward(x, w_enc, b_enc, w_dec, b_dec)
    out = jax.block_until_ready(out)

    ref = reference_forward(x, w_enc, b_enc, w_dec, b_dec)
    assert out.shape == (B, C, H, W)
    assert jnp.allclose(out, ref, atol=5e-3, rtol=0), float(jnp.abs(out - ref).max())

    print("KERNEL_OK")
</pallas_src>

<mosaic_0001>
module attributes {stable_mosaic.version = 11 : i64} {
  func.func @autoencoder_kernel(%arg0: i32, %arg1: memref<2x1024xf32, #tpu.memory_space<vmem>>, %arg2: memref<1024x128xbf16, #tpu.memory_space<vmem>>, %arg3: memref<1x128xf32, #tpu.memory_space<vmem>>, %arg4: memref<128x1024xbf16, #tpu.memory_space<vmem>>, %arg5: memref<1x1024xf32, #tpu.memory_space<vmem>>, %arg6: memref<2x1024xf32, #tpu.memory_space<vmem>>) attributes {dimension_semantics = [#tpu.dimension_semantics<parallel>], iteration_bounds = array<i64: 1>, scalar_prefetch = 0 : i64, scratch_operands = 0 : i64, tpu.core_type = #tpu.core_type<tc>, window_params = [{transform_indices = @transform_0, window_bounds = array<i64: 2, 1024>}, {pipeline_mode = #tpu.pipeline_mode<synchronous>, transform_indices = @transform_1, window_bounds = array<i64: 1024, 128>}, {pipeline_mode = #tpu.pipeline_mode<synchronous>, transform_indices = @transform_2, window_bounds = array<i64: 1, 128>}, {pipeline_mode = #tpu.pipeline_mode<synchronous>, transform_indices = @transform_3, window_bounds = array<i64: 128, 1024>}, {pipeline_mode = #tpu.pipeline_mode<synchronous>, transform_indices = @transform_4, window_bounds = array<i64: 1, 1024>}, {transform_indices = @transform_5, window_bounds = array<i64: 2, 1024>}]} {
    %c0 = arith.constant 0 : index
    %c0_0 = arith.constant 0 : index
    %0 = vector.load %arg1[%c0, %c0_0] : memref<2x1024xf32, #tpu.memory_space<vmem>>, vector<2x1024xf32>
    %1 = arith.truncf %0 : vector<2x1024xf32> to vector<2x1024xbf16>
    %c0_1 = arith.constant 0 : index
    %c0_2 = arith.constant 0 : index
    %2 = vector.load %arg2[%c0_1, %c0_2] : memref<1024x128xbf16, #tpu.memory_space<vmem>>, vector<1024x128xbf16>
    %cst = arith.constant dense<0.000000e+00> : vector<2x128xf32>
    %3 = tpu.matmul %1, %2, %cst {dimension_numbers = #tpu.dot_dimension_numbers<[1], [0], [0], [1], [0, 0, 1, 1], [], []>} : vector<2x1024xbf16>, vector<1024x128xbf16>, vector<2x128xf32> -> vector<2x128xf32>
    %c0_3 = arith.constant 0 : index
    %c0_4 = arith.constant 0 : index
    %4 = vector.load %arg3[%c0_3, %c0_4] : memref<1x128xf32, #tpu.memory_space<vmem>>, vector<1x128xf32>
    %5 = vector.broadcast %4 : vector<1x128xf32> to vector<2x128xf32>
    %6 = arith.addf %3, %5 : vector<2x128xf32>
    %7 = arith.negf %6 : vector<2x128xf32>
    %8 = math.exp %7 : vector<2x128xf32>
    %cst_5 = arith.constant 1.000000e+00 : f32
    %9 = vector.broadcast %cst_5 : f32 to vector<2x128xf32>
    %10 = arith.addf %9, %8 : vector<2x128xf32>
    %11 = arith.divf %9, %10 : vector<2x128xf32>
    %12 = arith.truncf %11 : vector<2x128xf32> to vector<2x128xbf16>
    %c0_6 = arith.constant 0 : index
    %c0_7 = arith.constant 0 : index
    %13 = vector.load %arg4[%c0_6, %c0_7] : memref<128x1024xbf16, #tpu.memory_space<vmem>>, vector<128x1024xbf16>
    %cst_8 = arith.constant dense<0.000000e+00> : vector<2x1024xf32>
    %14 = tpu.matmul %12, %13, %cst_8 {dimension_numbers = #tpu.dot_dimension_numbers<[1], [0], [0], [1], [0, 0, 1, 1], [], []>} : vector<2x128xbf16>, vector<128x1024xbf16>, vector<2x1024xf32> -> vector<2x1024xf32>
    %c0_9 = arith.constant 0 : index
    %c0_10 = arith.constant 0 : index
    %15 = vector.load %arg5[%c0_9, %c0_10] : memref<1x1024xf32, #tpu.memory_space<vmem>>, vector<1x1024xf32>
    %16 = vector.broadcast %15 : vector<1x1024xf32> to vector<2x1024xf32>
    %17 = arith.addf %14, %16 : vector<2x1024xf32>
    %18 = arith.negf %17 : vector<2x1024xf32>
    %19 = math.exp %18 : vector<2x1024xf32>
    %cst_11 = arith.constant 1.000000e+00 : f32
    %20 = vector.broadcast %cst_11 : f32 to vector<2x1024xf32>
    %21 = arith.addf %20, %19 : vector<2x1024xf32>
    %22 = arith.divf %20, %21 : vector<2x1024xf32>
    %c0_12 = arith.constant 0 : index
    %c0_13 = arith.constant 0 : index
    %23 = vector.load %arg6[%c0_12, %c0_13] : memref<2x1024xf32, #tpu.memory_space<vmem>>, vector<2x1024xf32>
    tpu.vector_store %arg6[%c0_12, %c0_13], %22 {strides = array<i32>} : memref<2x1024xf32, #tpu.memory_space<vmem>>, vector<2x1024xf32>,
    return
  }
  func.func @transform_0(%arg0: i32) -> (i32, i32) {
    %c0_i32 = arith.constant 0 : i32
    %c0_i32_0 = arith.constant 0 : i32
    return %arg0, %c0_i32 : i32, i32
  }
  func.func @transform_1(%arg0: i32) -> (i32, i32) {
    %c0_i32 = arith.constant 0 : i32
    %c0_i32_0 = arith.constant 0 : i32
    %c0_i32_1 = arith.constant 0 : i32
    return %c0_i32, %c0_i32_0 : i32, i32
  }
  func.func @transform_2(%arg0: i32) -> (i32, i32) {
    %c0_i32 = arith.constant 0 : i32
    %c0_i32_0 = arith.constant 0 : i32
    %c0_i32_1 = arith.constant 0 : i32
    return %c0_i32, %c0_i32_0 : i32, i32
  }
  func.func @transform_3(%arg0: i32) -> (i32, i32) {
    %c0_i32 = arith.constant 0 : i32
    %c0_i32_0 = arith.constant 0 : i32
    %c0_i32_1 = arith.constant 0 : i32
    return %c0_i32, %c0_i32_0 : i32, i32
  }
  func.func @transform_4(%arg0: i32) -> (i32, i32) {
    %c0_i32 = arith.constant 0 : i32
    %c0_i32_0 = arith.constant 0 : i32
    %c0_i32_1 = arith.constant 0 : i32
    return %c0_i32, %c0_i32_0 : i32, i32
  }
  func.func @transform_5(%arg0: i32) -> (i32, i32) {
    %c0_i32 = arith.constant 0 : i32
    %c0_i32_0 = arith.constant 0 : i32
    return %arg0, %c0_i32 : i32, i32
  }
}

</mosaic_0001>

<bundles_post_ra>
// kernel: tpu_custom_call.1
= control target key start
LH: loop header
LB: loop body
LE: loop exit
PB: predicated region body
PF: predicated region fallthrough
CT: control target
= control target key end

     0   :  { %10 = vsyncpa [#allocation3], 0  ;;  %s2070_s0 = inlined_call_operand.hbm [shape: f32[2,1024], index: 0, kind: input, shape index: {}]   ;;  %s2071_s1 = inlined_call_operand.hbm [shape: bf16[1024,128], index: 1, kind: input, shape index: {}]   ;;  %s2072_s2 = inlined_call_operand.vmem [shape: f32[1,128], index: 2, kind: input, shape index: {}]   ;;  %s2073_s3 = inlined_call_operand.hbm [shape: bf16[128,1024], index: 3, kind: input, shape index: {}]   ;;  %s2074_s4 = inlined_call_operand.vmem [shape: f32[1,1024], index: 4, kind: input, shape index: {}]   ;;  %s2075_s5 = inlined_call_operand.hbm [shape: f32[2,1024], index: 5, kind: output, shape index: {}]  }
   0x1   :  { %11 = vsyncpa [#allocation6], 0 }
   0x2   :  { %12 = vsyncpa [#allocation4], 0  ;;  %s1933_s18 = smov [#allocation5]   ;;  %s1839_s22 = scalar_lea.hbm %s2071_s1, 8192 }
   0x3   :  { %s28_s19 = sshll.u32 %s1933_s18, 4  ;;  %p1840_p0 = scmp.ne.s32.totalorder %s2071_s1, %s1839_s22  ;;  %s29_s19 = int_to_ptr.vmem [resolvable:$true] %s28_s19 }
   0x4   :  { %p1843_p1 = scmp.lt.u32.totalorder %s1839_s22, %s2071_s1 }
   0x6   :  { %p1845_p2 = pnand %p1843_p1, %p1840_p0 }
   0x8   :  { %1848 = shalt.err (!%p1845_p2)
}
   0x9   :  { %s1849_s27 = scalar_lea.vmem %s29_s19, 8192  ;;  %p1854_p4 = scmp.lt.s32.totalorder %s29_s19, %s29_s19 }
   0xa   :  { %p1850_p3 = scmp.ne.s32.totalorder %s29_s19, %s1849_s27  ;;  %p1855_p5 = scmp.lt.s32.totalorder %s1849_s27, %s1849_s27 }
   0xc   :  { %p1856_p6 = por %p1855_p5, %p1854_p4 }
   0xe   :  { %p1857_p7 = pnand %p1856_p6, %p1850_p3 }
  0x10   :  { %1860 = shalt.err (!%p1857_p7)
}
  0x11   :  { %s1934_s28 = smov 64   ;;  %s1935_s29 = smov 4  }
  0x12   :  { %34 = dma.hbm_to_vmem [thread:$0]  %s2071_s1, 8192, %s29_s19, [#allocation6], %s1934_s28, %s1934_s28, %s1935_s29  }
  0x13   :  { %s1936_s7 = smov [#allocation2]   ;;  %s1937_s9 = smov [#allocation7]  }
  0x14   :  { %s19_s8 = sshll.u32 %s1936_s7, 4  ;;  %s42_s10 = sshll.u32 %s1937_s9, 4  ;;  %s20_s8 = int_to_ptr.vmem [resolvable:$true] %s19_s8  ;;  %s43_s10 = int_to_ptr.vmem [resolvable:$true] %s42_s10 }
  0x15   :  { %s1861_s13 = scalar_lea.hbm %s2070_s0, 256 }
  0x16   :  { %p1862_p8 = scmp.ne.s32.totalorder %s2070_s0, %s1861_s13  ;;  %p1865_p9 = scmp.lt.u32.totalorder %s1861_s13, %s2070_s0 }
  0x18   :  { %p1867_p10 = pnand %p1865_p9, %p1862_p8 }
  0x1a   :  { %1870 = shalt.err (!%p1867_p10)
}
  0x1b   :  { %s1871_s1 = scalar_lea.vmem %s20_s8, 256  ;;  %p1876_p12 = scmp.lt.s32.totalorder %s20_s8, %s20_s8 }
  0x1c   :  { %p1872_p11 = scmp.ne.s32.totalorder %s20_s8, %s1871_s1  ;;  %p1877_p13 = scmp.lt.s32.totalorder %s1871_s1, %s1871_s1 }
  0x1e   :  { %p1878_p0 = por %p1877_p13, %p1876_p12 }
  0x20   :  { %p1879_p1 = pnand %p1878_p0, %p1872_p11 }
  0x22   :  { %1882 = shalt.err (!%p1879_p1)
}
  0x23   :  { %22 = dma.hbm_to_vmem [thread:$0]  %s2070_s0, 256, %s20_s8, [#allocation3]  }
  0x24   :  { %s1883_s22 = scalar_lea.hbm %s2073_s3, 8192 }
  0x25   :  { %p1884_p2 = scmp.ne.s32.totalorder %s2073_s3, %s1883_s22  ;;  %p1887_p3 = scmp.lt.u32.totalorder %s1883_s22, %s2073_s3 }
  0x27   :  { %p1889_p4 = pnand %p1887_p3, %p1884_p2 }
  0x29   :  { %1892 = shalt.err (!%p1889_p4)
}
  0x2a   :  { %s1893_s27 = scalar_lea.vmem %s43_s10, 8192  ;;  %p1898_p6 = scmp.lt.s32.totalorder %s43_s10, %s43_s10 }
  0x2b   :  { %p1894_p5 = scmp.ne.s32.totalorder %s43_s10, %s1893_s27  ;;  %p1899_p7 = scmp.lt.s32.totalorder %s1893_s27, %s1893_s27 }
  0x2d   :  { %p1900_p8 = por %p1899_p7, %p1898_p6 }
  0x2f   :  { %p1901_p9 = pnand %p1900_p8, %p1894_p5 }
  0x31   :  { %1904 = shalt.err (!%p1901_p9)
}
  0x32   :  { %s1938_s0 = smov 512   ;;  %s1939_s28 = smov 32  }
  0x33   :  { %48 = dma.hbm_to_vmem [thread:$0]  %s2073_s3, 8192, %s43_s10, [#allocation6], %s1938_s0, %s1938_s0, %s1939_s28  }
  0x34   :  { %1927 = dma.done.wait [#allocation3], 256  }
  0x35   :  { %1928 = vsyncadd [#allocation3], 4294967040 }
  0x36   :  { %1929 = dma.done.wait [#allocation6], 16384  }
  0x37   :  { %1930 = vsyncadd [#allocation6], 4294950912  ;;  %v1737_v0 = vld [vmem:[#allocation5 + $0x40] sm:$0xff]   ;;  %v1741_v4 = vld [vmem:[#allocation5 + $0x48] sm:$0xff]   ;;  %v1940_v22 = vmov 1983009808   ;;  %v69_v24 = vlaneseq }
  0x38   :  { %v1738_v1 = vld [vmem:[#allocation5 + $0xc0] sm:$0xff]   ;;  %1639 = vmatprep.subr.bf16.mxu0 %v1737_v0  ;;  %v1742_v5 = vld [vmem:[#allocation5 + $0xc8] sm:$0xff]   ;;  %v1745_v8 = vld [vmem:[#allocation5 + $0x50] sm:$0xff]   ;;  %v67_v23 = vunpack.c.l.s4 %v1940_v22 }
  0x39   :  { %v1739_v2 = vld [vmem:[#allocation5] sm:$0xff]   ;;  %1661 = vmatprep.subr.bf16.mxu1 %v1738_v1  ;;  %v1743_v6 = vld [vmem:[#allocation5 + $0x8] sm:$0xff]   ;;  %v1746_v9 = vld [vmem:[#allocation5 + $0xd0] sm:$0xff]   ;;  %v2009_v30 = vshrl.u32 %v69_v24, 7 }
  0x3a   :  { %v1740_v3 = vld [vmem:[#allocation5 + $0x80] sm:$0xff]   ;;  %1640 = vmatpush3.bf16.msra.mxu0 %v1739_v2  ;;  %v1744_v7 = vld [vmem:[#allocation5 + $0x88] sm:$0xff]   ;;  %v1747_v10 = vld [vmem:[#allocation5 + $0x10] sm:$0xff]   ;;  %v68_v29 = vunpack.c.0.s8 %v67_v23 }
  0x3b   :  { %1662 = vmatpush3.bf16.msra.mxu1 %v1740_v3  ;;  %1641 = vmatprep.subr.bf16.mxu0 %v1741_v4  ;;  %v1748_v11 = vld [vmem:[#allocation5 + $0x90] sm:$0xff]   ;;  %v1749_v12 = vld [vmem:[#allocation5 + $0x58] sm:$0xff]   ;;  %v1753_v16 = vld [vmem:[#allocation5 + $0x60] sm:$0xff]  }
  0x3c   :  { %1663 = vmatprep.subr.bf16.mxu1 %v1742_v5  ;;  %v1750_v13 = vld [vmem:[#allocation5 + $0xd8] sm:$0xff]   ;;  %v1754_v17 = vld [vmem:[#allocation5 + $0xe0] sm:$0xff]   ;;  %v1757_v20 = vld [vmem:[#allocation5 + $0x68] sm:$0xff]   ;;  %v2012_v35 = vsub.s32 %v68_v29, %v2009_v30 }
  0x3d   :  { %v1751_v14 = vld [vmem:[#allocation5 + $0x18] sm:$0xff]   ;;  %v1755_v18 = vld [vmem:[#allocation5 + $0x20] sm:$0xff]   ;;  %v1758_v21 = vld [vmem:[#allocation5 + $0xe8] sm:$0xff]  }
  0x3e   :  { %1642 = vmatpush3.bf16.msra.mxu0 %v1743_v6  ;;  %v1752_v15 = vld [vmem:[#allocation5 + $0x98] sm:$0xff]   ;;  %v1756_v19 = vld [vmem:[#allocation5 + $0xa0] sm:$0xff]   ;;  %v1759_v25 = vld [vmem:[#allocation5 + $0x28] sm:$0xff]  }
  0x3f   :  { %1664 = vmatpush3.bf16.msra.mxu1 %v1744_v7  ;;  %1643 = vmatprep.subr.bf16.mxu0 %v1745_v8  ;;  %v1760_v26 = vld [vmem:[#allocation5 + $0xa8] sm:$0xff]   ;;  %v1761_v27 = vld [vmem:[#allocation5 + $0x70] sm:$0xff]   ;;  %v1765_v33 = vld [vmem:[#allocation5 + $0x78] sm:$0xff]  }
  0x40   :  { %1665 = vmatprep.subr.bf16.mxu1 %v1746_v9  ;;  %v1762_v28 = vld [vmem:[#allocation5 + $0xf0] sm:$0xff]   ;;  %v1766_v34 = vld [vmem:[#allocation5 + $0xf8] sm:$0xff]   ;;  %v1770_v41 = vld [vmem:[#allocation5 + $0x140] sm:$0xff]  }
  0x41   :  { %v1763_v31 = vld [vmem:[#allocation5 + $0x30] sm:$0xff]   ;;  %v1767_v36 = vld [vmem:[#allocation5 + $0x38] sm:$0xff]   ;;  %v1771_v42 = vld [vmem:[#allocation5 + $0x1c0] sm:$0xff]  }
  0x42   :  { %1644 = vmatpush3.bf16.msra.mxu0 %v1747_v10  ;;  %v1764_v32 = vld [vmem:[#allocation5 + $0xb0] sm:$0xff]   ;;  %v1768_v37 = vld [vmem:[#allocation5 + $0xb8] sm:$0xff]   ;;  %v1772_v48 = vld [vmem:[#allocation5 + $0x100] sm:$0xff]  }
  0x43   :  { %1666 = vmatpush3.bf16.msra.mxu1 %v1748_v11  ;;  %1645 = vmatprep.subr.bf16.mxu0 %v1749_v12  ;;  %v61_v38 = vld [vmem:[#allocation2] sm:$0xff]  ;;  %v1774_v50 = vld [vmem:[#allocation5 + $0x148] sm:$0xff]   ;;  %v1773_v52 = vld [vmem:[#allocation5 + $0x180] sm:$0xff]  }
  0x44   :  { %1667 = vmatprep.subr.bf16.mxu1 %v1750_v13  ;;  %v72_v39 = vrot.slane %v61_v38, %v2012_v35  ;;  %v65_v40 = vcombine.high %v61_v38, %v61_v38  ;;  %v1775_v53 = vld [vmem:[#allocation5 + $0x1c8] sm:$0xff]   ;;  %v1778_v55 = vld [vmem:[#allocation5 + $0x150] sm:$0xff]   ;;  %v1782_v59 = vld [vmem:[#allocation5 + $0x158] sm:$0xff]  }
  0x45   :  { %v1776_v54 = vld [vmem:[#allocation5 + $0x108] sm:$0xff]   ;;  %v1779_v57 = vld [vmem:[#allocation5 + $0x1d0] sm:$0xff]   ;;  %v1783_v61 = vld [vmem:[#allocation5 + $0x1d8] sm:$0xff]  }
  0x46   :  { %1646 = vmatpush3.bf16.msra.mxu0 %v1751_v14  ;;  %v80_v43 = vcombine.high %v72_v39, %v72_v39  ;;  %v79_v44 = vrot.slane %v65_v40, %v2012_v35  ;;  %v107_v45 = vpack.c.bf16 %v72_v39, %v72_v39  ;;  %v1777_v56 = vld [vmem:[#allocation5 + $0x188] sm:$0xff]   ;;  %v1780_v58 = vld [vmem:[#allocation5 + $0x110] sm:$0xff]   ;;  %v1784_v62 = vld [vmem:[#allocation5 + $0x118] sm:$0xff]  }
  0x47   :  { %1668 = vmatpush3.bf16.msra.mxu1 %v1752_v15  ;;  %1647 = vmatprep.subr.bf16.mxu0 %v1753_v16  ;;  %v1781_v60 = vld [vmem:[#allocation5 + $0x190] sm:$0xff]   ;;  %v1786_v63 = vld [vmem:[#allocation5 + $0x160] sm:$0xff]   ;;  %v1785_v0 = vld [vmem:[#allocation5 + $0x198] sm:$0xff]  }
  0x48   :  { %1669 = vmatprep.subr.bf16.mxu1 %v1754_v17  ;;  %v108_v46 = vpack.c.bf16 %v80_v43, %v80_v43  ;;  %v81_v47 = vcombine.high %v79_v44, %v79_v44  ;;  %v109_v49 = vpack.c.bf16 %v79_v44, %v79_v44  ;;  %v1787_v1 = vld [vmem:[#allocation5 + $0x1e0] sm:$0xff]   ;;  %v1790_v3 = vld [vmem:[#allocation5 + $0x168] sm:$0xff]   ;;  %v1794_v7 = vld [vmem:[#allocation5 + $0x170] sm:$0xff]  }
  0x49   :  { %v1788_v2 = vld [vmem:[#allocation5 + $0x120] sm:$0xff]   ;;  %v1791_v5 = vld [vmem:[#allocation5 + $0x1e8] sm:$0xff]   ;;  %v1795_v9 = vld [vmem:[#allocation5 + $0x1f0] sm:$0xff]  }
  0x4a   :  { %1648 = vmatpush3.bf16.msra.mxu0 %v1755_v18  ;;  %666 = vmatprep.mubr.bf16.mxu0 %v108_v46  ;;  %v110_v51 = vpack.c.bf16 %v81_v47, %v81_v47  ;;  %v1789_v4 = vld [vmem:[#allocation5 + $0x1a0] sm:$0xff]   ;;  %v1792_v6 = vld [vmem:[#allocation5 + $0x128] sm:$0xff]   ;;  %v1796_v10 = vld [vmem:[#allocation5 + $0x130] sm:$0xff]  }
  0x4b   :  { %1670 = vmatpush3.bf16.msra.mxu1 %v1756_v19  ;;  %1649 = vmatprep.subr.bf16.mxu0 %v1757_v20  ;;  %v1793_v8 = vld [vmem:[#allocation5 + $0x1a8] sm:$0xff]   ;;  %v1798_v11 = vld [vmem:[#allocation5 + $0x178] sm:$0xff]   ;;  %v1797_v12 = vld [vmem:[#allocation5 + $0x1b0] sm:$0xff]  }
  0x4c   :  { %1671 = vmatprep.subr.bf16.mxu1 %v1758_v21  ;;  %706 = vmatprep.mubr.bf16.mxu1 %v110_v51  ;;  %v1799_v13 = vld [vmem:[#allocation5 + $0x1f8] sm:$0xff]   ;;  %v810_v38 = vld [vmem:[#allocation7 + $0x48] sm:$0xff]  ;;  %v817_v44 = vld [vmem:[#allocation7 + $0x80] sm:$0xff] }
  0x4d   :  { %v62_v14 = vld [vmem:[#allocation2 + $0x8] sm:$0xff]  ;;  %v814_v40 = vld [vmem:[#allocation7 + $0x68] sm:$0xff] }
  0x4e   :  { %1650 = vmatpush3.bf16.msra.mxu0 %v1759_v25  ;;  %v1800_v15 = vld [vmem:[#allocation5 + $0x138] sm:$0xff]   ;;  %v89_v16 = vrot.slane %v62_v14, %v2012_v35  ;;  %v82_v17 = vcombine.high %v62_v14, %v62_v14  ;;  %v1578_v43 = vcombine.high %v810_v38, %v814_v40  ;;  %v818_v46 = vld [vmem:[#allocation7 + $0x88] sm:$0xff] }
  0x4f   :  { %1672 = vmatpush3.bf16.msra.mxu1 %v1760_v26  ;;  %1651 = vmatprep.subr.bf16.mxu0 %v1761_v27  ;;  %v1801_v18 = vld [vmem:[#allocation5 + $0x1b8] sm:$0xff]   ;;  %v801_v26 = vld [vmem:[#allocation7] sm:$0xff] }
  0x50   :  { %1673 = vmatprep.subr.bf16.mxu1 %v1762_v28  ;;  %v97_v19 = vcombine.high %v89_v16, %v89_v16  ;;  %v96_v20 = vrot.slane %v82_v17, %v2012_v35  ;;  %v111_v21 = vpack.c.bf16 %v89_v16, %v89_v16  ;;  %v805_v27 = vld [vmem:[#allocation7 + $0x20] sm:$0xff]  ;;  %v802_v28 = vld [vmem:[#allocation7 + $0x8] sm:$0xff] }
  0x51   :  { %v1568_v29 = vcombine.high %v801_v26, %v805_v27  ;;  %v854_v16 = vld [vmem:[#allocation7 + $0x1a8] sm:$0xff]  ;;  %v857_v17 = vld [vmem:[#allocation7 + $0x1c0] sm:$0xff] }
  0x52   :  { %1652 = vmatpush3.bf16.msra.mxu0 %v1763_v31  ;;  %v112_v22 = vpack.c.bf16 %v97_v19, %v97_v19  ;;  %v98_v23 = vcombine.high %v96_v20, %v96_v20  ;;  %v113_v24 = vpack.c.bf16 %v96_v20, %v96_v20  ;;  %v806_v31 = vld [vmem:[#allocation7 + $0x28] sm:$0xff]  ;;  %v861_v20 = vld [vmem:[#allocation7 + $0x1e0] sm:$0xff] }
  0x53   :  { %1674 = vmatpush3.bf16.msra.mxu1 %v1764_v32  ;;  %1653 = vmatprep.subr.bf16.mxu0 %v1765_v33  ;;  %v1567_v32 = vcombine.low %v801_v26, %v805_v27  ;;  %v1569_v33 = vcombine.low %v802_v28, %v806_v31  ;;  %v2024_v26 = vld [vmem:[#allocation7 + $0x18] sm:$0xff] }
  0x54   :  { %1675 = vmatprep.subr.bf16.mxu1 %v1766_v34  ;;  %v114_v25 = vpack.c.bf16 %v98_v23, %v98_v23  ;;  %v1570_v34 = vcombine.high %v802_v28, %v806_v31  ;;  %v1624_v28 = vcombine.high %v857_v17, %v861_v20  ;;  %v808_v31 = vld [vmem:[#allocation7 + $0x38] sm:$0xff] }
  0x56   :  { %1654 = vmatpush3.bf16.msra.mxu0 %v1767_v36  ;;  %v809_v36 = vld [vmem:[#allocation7 + $0x40] sm:$0xff] }
  0x57   :  { %1676 = vmatpush3.bf16.msra.mxu1 %v1768_v37  ;;  %1683 = vmatprep.subr.bf16.mxu0 %v1770_v41  ;;  %v813_v37 = vld [vmem:[#allocation7 + $0x60] sm:$0xff] }
  0x58   :  { %1705 = vmatprep.subr.bf16.mxu1 %v1771_v42  ;;  %v1576_v39 = vcombine.high %v809_v36, %v813_v37  ;;  %v1575_v41 = vcombine.low %v809_v36, %v813_v37  ;;  %v1577_v42 = vcombine.low %v810_v38, %v814_v40  ;;  %v1574_v38 = vcombine.high %v2024_v26, %v808_v31  ;;  %v1501_v40 = vld [vmem:[%s2072_s2] ss:$0 sm:$0xff] }
  0x59   :  { %667 = vmatmul.mubr.bf16.vlgmr.msra.gmra.mrb[0].mxu0 %v107_v45  ;;  %v821_v45 = vld [vmem:[#allocation7 + $0xa0] sm:$0xff] }
  0x5a   :  { %1684 = vmatpush3.bf16.msra.mxu0 %v1772_v48  ;;  %707 = vmatmul.mubr.bf16.vlgmr.msra.gmra.mrb[0].mxu1 %v109_v49  ;;  %v1584_v47 = vcombine.high %v817_v44, %v821_v45  ;;  %v822_v48 = vld [vmem:[#allocation7 + $0xa8] sm:$0xff]  ;;  %v1583_v49 = vcombine.low %v817_v44, %v821_v45 }
  0x5b   :  { %1685 = vmatprep.subr.bf16.mxu0 %v1774_v50  ;;  %1706 = vmatpush3.bf16.msra.mxu1 %v1773_v52  ;;  %v1585_v50 = vcombine.low %v818_v46, %v822_v48  ;;  %v1586_v51 = vcombine.high %v818_v46, %v822_v48  ;;  %v825_v52 = vld [vmem:[#allocation7 + $0xc0] sm:$0xff] }
  0x5c   :  { %1707 = vmatprep.subr.bf16.mxu1 %v1775_v53  ;;  %746 = vmatprep.mubr.bf16.mxu0 %v112_v22  ;;  %v829_v53 = vld [vmem:[#allocation7 + $0xe0] sm:$0xff]  ;;  %v862_v22 = vld [vmem:[#allocation7 + $0x1e8] sm:$0xff] }
  0x5d   :  { %786 = vmatprep.mubr.bf16.mxu1 %v114_v25  ;;  %v2022_v25 = vld [vmem:[#allocation7 + $0x30] sm:$0xff] }
  0x5e   :  { %1686 = vmatpush3.bf16.msra.mxu0 %v1776_v54  ;;  %v826_v54 = vld [vmem:[#allocation7 + $0xc8] sm:$0xff] }
  0x5f   :  { %1687 = vmatprep.subr.bf16.mxu0 %v1778_v55  ;;  %1708 = vmatpush3.bf16.msra.mxu1 %v1777_v56  ;;  %v1592_v55 = vcombine.high %v825_v52, %v829_v53  ;;  %v830_v56 = vld [vmem:[#allocation7 + $0xe8] sm:$0xff] }
  0x60   :  { %1709 = vmatprep.subr.bf16.mxu1 %v1779_v57  ;;  %v1591_v57 = vcombine.low %v825_v52, %v829_v53 }
  0x62   :  { %1688 = vmatpush3.bf16.msra.mxu0 %v1780_v58  ;;  %v1593_v58 = vcombine.low %v826_v54, %v830_v56 }
  0x63   :  { %1689 = vmatprep.subr.bf16.mxu0 %v1782_v59  ;;  %1710 = vmatpush3.bf16.msra.mxu1 %v1781_v60  ;;  %v1594_v59 = vcombine.high %v826_v54, %v830_v56  ;;  %v833_v60 = vld [vmem:[#allocation7 + $0x100] sm:$0xff] }
  0x64   :  { %1711 = vmatprep.subr.bf16.mxu1 %v1783_v61  ;;  %v837_v61 = vld [vmem:[#allocation7 + $0x120] sm:$0xff] }
  0x66   :  { %1690 = vmatpush3.bf16.msra.mxu0 %v1784_v62  ;;  %v834_v62 = vld [vmem:[#allocation7 + $0x108] sm:$0xff] }
  0x67   :  { %1691 = vmatprep.subr.bf16.mxu0 %v1786_v63  ;;  %1712 = vmatpush3.bf16.msra.mxu1 %v1785_v0  ;;  %v1600_v63 = vcombine.high %v833_v60, %v837_v61  ;;  %v838_v0 = vld [vmem:[#allocation7 + $0x128] sm:$0xff] }
  0x68   :  { %1713 = vmatprep.subr.bf16.mxu1 %v1787_v1  ;;  %v1599_v1 = vcombine.low %v833_v60, %v837_v61 }
  0x6a   :  { %1692 = vmatpush3.bf16.msra.mxu0 %v1788_v2  ;;  %v1601_v2 = vcombine.low %v834_v62, %v838_v0 }
  0x6b   :  { %1693 = vmatprep.subr.bf16.mxu0 %v1790_v3  ;;  %1714 = vmatpush3.bf16.msra.mxu1 %v1789_v4  ;;  %v1602_v3 = vcombine.high %v834_v62, %v838_v0  ;;  %v841_v4 = vld [vmem:[#allocation7 + $0x140] sm:$0xff] }
  0x6c   :  { %1715 = vmatprep.subr.bf16.mxu1 %v1791_v5  ;;  %v845_v5 = vld [vmem:[#allocation7 + $0x160] sm:$0xff] }
  0x6e   :  { %1694 = vmatpush3.bf16.msra.mxu0 %v1792_v6  ;;  %v842_v6 = vld [vmem:[#allocation7 + $0x148] sm:$0xff] }
  0x6f   :  { %1695 = vmatprep.subr.bf16.mxu0 %v1794_v7  ;;  %1716 = vmatpush3.bf16.msra.mxu1 %v1793_v8  ;;  %v1607_v7 = vcombine.low %v841_v4, %v845_v5  ;;  %v1608_v8 = vcombine.high %v841_v4, %v845_v5  ;;  %v815_v4 = vld [vmem:[#allocation7 + $0x70] sm:$0xff]  ;;  %v812_v5 = vld [vmem:[#allocation7 + $0x58] sm:$0xff] }
  0x70   :  { %1717 = vmatprep.subr.bf16.mxu1 %v1795_v9  ;;  %v846_v9 = vld [vmem:[#allocation7 + $0x168] sm:$0xff] }
  0x72   :  { %1696 = vmatpush3.bf16.msra.mxu0 %v1796_v10  ;;  %v849_v10 = vld [vmem:[#allocation7 + $0x180] sm:$0xff] }
  0x73   :  { %1697 = vmatprep.subr.bf16.mxu0 %v1798_v11  ;;  %1718 = vmatpush3.bf16.msra.mxu1 %v1797_v12  ;;  %v853_v11 = vld [vmem:[#allocation7 + $0x1a0] sm:$0xff]  ;;  %v1609_v12 = vcombine.low %v842_v6, %v846_v9 }
  0x74   :  { %1719 = vmatprep.subr.bf16.mxu1 %v1799_v13  ;;  %v1610_v13 = vcombine.high %v842_v6, %v846_v9  ;;  %v1616_v14 = vcombine.high %v849_v10, %v853_v11  ;;  %v1615_v23 = vcombine.low %v849_v10, %v853_v11  ;;  %v816_v6 = vld [vmem:[#allocation7 + $0x78] sm:$0xff]  ;;  %v819_v11 = vld [vmem:[#allocation7 + $0x90] sm:$0xff] }
  0x75   :  { %v1582_v10 = vcombine.high %v812_v5, %v816_v6 }
  0x76   :  { %1698 = vmatpush3.bf16.msra.mxu0 %v1800_v15  ;;  %v850_v15 = vld [vmem:[#allocation7 + $0x188] sm:$0xff] }
  0x77   :  { %1720 = vmatpush3.bf16.msra.mxu1 %v1801_v18  ;;  %1227 = vmatprep.subr.bf16.mxu0 %v1568_v29  ;;  %v1941_v18 = vmov 0   ;;  %v1618_v19 = vcombine.high %v850_v15, %v854_v16  ;;  %v1617_v27 = vcombine.low %v850_v15, %v854_v16  ;;  %v1581_v16 = vcombine.low %v812_v5, %v816_v6 }
  0x78   :  { %1268 = vmatprep.subr.bf16.mxu1 %v1570_v34  ;;  %v1623_v34 = vcombine.low %v857_v17, %v861_v20  ;;  %v827_v20 = vld [vmem:[#allocation7 + $0xd0] sm:$0xff] }
  0x79   :  { %747 = vmatmul.mubr.bf16.vlgmr.msra.gmra.mrb[4].mxu0 %v111_v21  ;;  %v858_v21 = vld [vmem:[#allocation7 + $0x1c8] sm:$0xff] }
  0x7a   :  { %787 = vmatmul.mubr.bf16.vlgmr.msra.gmra.mrb[4].mxu1 %v113_v24  ;;  %1228 = vmatpush1.bf16.msra.mxu0 %v1567_v32  ;;  %v2020_v24 = vld [vmem:[#allocation7 + $0x10] sm:$0xff]  ;;  %v1626_v32 = vcombine.high %v858_v21, %v862_v22  ;;  %v1625_v36 = vcombine.low %v858_v21, %v862_v22  ;;  %v828_v22 = vld [vmem:[#allocation7 + $0xd8] sm:$0xff] }
  0x7b   :  { %1269 = vmatpush1.bf16.msra.mxu1 %v1569_v33  ;;  %1229 = vmatprep.subr.bf16.mxu0 %v1576_v39  ;;  %v1571_v29 = vcombine.low %v2020_v24, %v2022_v25  ;;  %v1573_v33 = vcombine.low %v2024_v26, %v808_v31  ;;  %v1572_v37 = vcombine.high %v2020_v24, %v2022_v25  ;;  %v831_v21 = vld [vmem:[#allocation7 + $0xf0] sm:$0xff]  ;;  %v836_v31 = vld [vmem:[#allocation7 + $0x118] sm:$0xff] }
  0x7c   :  { %1270 = vmatprep.subr.bf16.mxu1 %v1578_v43  ;;  %1259 = vmatprep.mubr.bf16.mxu0 %v1941_v18  ;;  %v1596_v26 = vcombine.high %v827_v20, %v831_v21 }
  0x7d   :  { %1300 = vmatprep.mubr.bf16.mxu1 %v1941_v18 }
  0x7e   :  { %1230 = vmatpush1.bf16.msra.mxu0 %v1575_v41 }
  0x7f   :  { %1271 = vmatpush1.bf16.msra.mxu1 %v1577_v42  ;;  %1231 = vmatprep.subr.bf16.mxu0 %v1584_v47 }
  0x80   :  { %1272 = vmatprep.subr.bf16.mxu1 %v1586_v51 }
  0x82   :  { %1232 = vmatpush1.bf16.msra.mxu0 %v1583_v49 }
  0x83   :  { %1273 = vmatpush1.bf16.msra.mxu1 %v1585_v50  ;;  %1233 = vmatprep.subr.bf16.mxu0 %v1592_v55 }
  0x84   :  { %1274 = vmatprep.subr.bf16.mxu1 %v1594_v59 }
  0x86   :  { %1234 = vmatpush1.bf16.msra.mxu0 %v1591_v57 }
  0x87   :  { %1275 = vmatpush1.bf16.msra.mxu1 %v1593_v58  ;;  %1235 = vmatprep.subr.bf16.mxu0 %v1600_v63 }
  0x88   :  { %1276 = vmatprep.subr.bf16.mxu1 %v1602_v3  ;;  %v811_v3 = vld [vmem:[#allocation7 + $0x50] sm:$0xff] }
  0x89   :  { %v1580_v9 = vcombine.high %v811_v3, %v815_v4  ;;  %v1579_v15 = vcombine.low %v811_v3, %v815_v4  ;;  %v881_v3 = vsub.s32 3, %v2009_v30 }
  0x8a   :  { %1236 = vmatpush1.bf16.msra.mxu0 %v1599_v1 }
  0x8b   :  { %1277 = vmatpush1.bf16.msra.mxu1 %v1601_v2  ;;  %1237 = vmatprep.subr.bf16.mxu0 %v1608_v8 }
  0x8c   :  { %1278 = vmatprep.subr.bf16.mxu1 %v1610_v13  ;;  %v820_v13 = vld [vmem:[#allocation7 + $0x98] sm:$0xff] }
  0x8e   :  { %1238 = vmatpush1.bf16.msra.mxu0 %v1607_v7 }
  0x8f   :  { %1279 = vmatpush1.bf16.msra.mxu1 %v1609_v12  ;;  %1239 = vmatprep.subr.bf16.mxu0 %v1616_v14  ;;  %v823_v12 = vld [vmem:[#allocation7 + $0xb0] sm:$0xff]  ;;  %v824_v14 = vld [vmem:[#allocation7 + $0xb8] sm:$0xff] }
  0x90   :  { %1280 = vmatprep.subr.bf16.mxu1 %v1618_v19  ;;  %v1588_v17 = vcombine.high %v819_v11, %v823_v12  ;;  %v1590_v19 = vcombine.high %v820_v13, %v824_v14  ;;  %v1587_v24 = vcombine.low %v819_v11, %v823_v12  ;;  %v1589_v25 = vcombine.low %v820_v13, %v824_v14 }
  0x92   :  { %1240 = vmatpush1.bf16.msra.mxu0 %v1615_v23  ;;  %v832_v23 = vld [vmem:[#allocation7 + $0xf8] sm:$0xff] }
  0x93   :  { %1281 = vmatpush1.bf16.msra.mxu1 %v1617_v27  ;;  %1241 = vmatprep.subr.bf16.mxu0 %v1624_v28  ;;  %v1598_v27 = vcombine.high %v828_v22, %v832_v23  ;;  %v835_v28 = vld [vmem:[#allocation7 + $0x110] sm:$0xff] }
  0x94   :  { %1282 = vmatprep.subr.bf16.mxu1 %v1626_v32  ;;  %v840_v32 = vld [vmem:[#allocation7 + $0x138] sm:$0xff] }
  0x96   :  { %1242 = vmatpush1.bf16.msra.mxu0 %v1623_v34  ;;  %v1597_v34 = vcombine.low %v828_v22, %v832_v23 }
  0x97   :  { %1283 = vmatpush1.bf16.msra.mxu1 %v1625_v36  ;;  %1309 = vmatprep.subr.bf16.mxu0 %v1572_v37  ;;  %v843_v37 = vld [vmem:[#allocation7 + $0x150] sm:$0xff] }
  0x98   :  { %1350 = vmatprep.subr.bf16.mxu1 %v1574_v38  ;;  %v847_v38 = vld [vmem:[#allocation7 + $0x170] sm:$0xff] }
 0x12c   :  { %v1655_v39 = vpop.f32.mrb[0].mxu0 }
 0x12d   :  { %v1656_v41 = vpop.f32.mrb[1].mxu0  ;;  %v1677_v42 = vpop.f32.mrb[0].mxu1 }
 0x12e   :  { %v1657_v43 = vadd.f32 %v1656_v41, %v1655_v39  ;;  %v1658_v44 = vpop.f32.mrb[2].mxu0  ;;  %v1678_v45 = vpop.f32.mrb[1].mxu1  ;;  %v844_v39 = vld [vmem:[#allocation7 + $0x158] sm:$0xff] }
 0x12f   :  { %v1659_v46 = vpop.f32.mrb[3].mxu0  ;;  %v1679_v48 = vadd.f32 %v1678_v45, %v1677_v42  ;;  %v1680_v49 = vpop.f32.mrb[2].mxu1  ;;  %v1605_v42 = vcombine.low %v836_v31, %v840_v32  ;;  %v851_v45 = vld [vmem:[#allocation7 + $0x190] sm:$0xff] }
 0x130   :  { %v669_v47 = vadd.f32 %v1657_v43, %v1501_v40  ;;  %v1681_v50 = vpop.f32.mrb[3].mxu1  ;;  %v848_v40 = vld [vmem:[#allocation7 + $0x178] sm:$0xff]  ;;  %v1612_v43 = vcombine.high %v843_v37, %v847_v38  ;;  %v855_v46 = vld [vmem:[#allocation7 + $0x1b0] sm:$0xff]  ;;  %v1611_v49 = vcombine.low %v843_v37, %v847_v38  ;;  %v897_v37 = vsub.s32 7, %v2009_v30 }
 0x131   :  { %v1614_v44 = vcombine.high %v844_v39, %v848_v40  ;;  %v1613_v50 = vcombine.low %v844_v39, %v848_v40 }
 0x132   :  { %v709_v51 = vadd.f32 %v1679_v48, %v669_v47  ;;  %v852_v47 = vld [vmem:[#allocation7 + $0x198] sm:$0xff] }
 0x133   :  { %v856_v48 = vld [vmem:[#allocation7 + $0x1b8] sm:$0xff] }
 0x14c   :  { %v1699_v52 = vpop.f32.mrb[4].mxu0 }
 0x14d   :  { %v1700_v53 = vpop.f32.mrb[5].mxu0  ;;  %v1721_v54 = vpop.f32.mrb[4].mxu1 }
 0x14e   :  { %v1701_v55 = vadd.f32 %v1700_v53, %v1699_v52  ;;  %v1702_v56 = vpop.f32.mrb[6].mxu0  ;;  %v1722_v57 = vpop.f32.mrb[5].mxu1  ;;  %v1622_v52 = vcombine.high %v852_v47, %v856_v48  ;;  %v859_v53 = vld [vmem:[#allocation7 + $0x1d0] sm:$0xff] }
 0x14f   :  { %v1703_v58 = vpop.f32.mrb[7].mxu0  ;;  %v1723_v60 = vadd.f32 %v1722_v57, %v1721_v54  ;;  %v1724_v61 = vpop.f32.mrb[6].mxu1  ;;  %v863_v54 = vld [vmem:[#allocation7 + $0x1f0] sm:$0xff]  ;;  %v864_v56 = vld [vmem:[#allocation7 + $0x1f8] sm:$0xff]  ;;  %v1619_v57 = vcombine.low %v851_v45, %v855_v46 }
 0x150   :  { %v749_v59 = vadd.f32 %v1701_v55, %v709_v51  ;;  %v1725_v62 = vpop.f32.mrb[7].mxu1  ;;  %v1620_v51 = vcombine.high %v851_v45, %v855_v46  ;;  %v860_v55 = vld [vmem:[#allocation7 + $0x1d8] sm:$0xff]  ;;  %v1621_v58 = vcombine.low %v852_v47, %v856_v48  ;;  %v1627_v61 = vcombine.low %v859_v53, %v863_v54 }
 0x151   :  { %v1629_v62 = vcombine.low %v860_v55, %v864_v56 }
 0x152   :  { %v789_v63 = vadd.f32 %v1723_v60, %v749_v59  ;;  %v1628_v59 = vcombine.high %v859_v53, %v863_v54  ;;  %v1630_v60 = vcombine.high %v860_v55, %v864_v56 }
 0x154   :  { %v1566_v0 = vmul.f32 -1.442695, %v789_v63  ;;  %v869_v63 = vsub.s32 0, %v2009_v30 }
 0x156   :  { %1803 = vpow2.f32 %v1566_v0  ;;  %v877_v0 = vsub.s32 2, %v2009_v30 }
 0x160   :  { %v1804_v1 = vpop.eup %1803 }
 0x161   :  { %v797_v2 = vadd.f32 1.0, %v1804_v1  ;;  %v865_v1 = vld [vmem:[%s2074_s4] sm:$0xff]  ;;  %s1942_s4 = smov [#allocation8]  }
 0x162   :  { %v870_v4 = vrot.slane %v865_v1, %v869_v63  ;;  %v878_v5 = vrot.slane %v865_v1, %v877_v0  ;;  %s1491_s8 = sshll.u32 %s1942_s4, 4  ;;  %s1492_s8 = int_to_ptr.vmem [resolvable:$true] %s1491_s8 }
 0x163   :  { %1805 = vrcp.f32 %v797_v2  ;;  %v873_v2 = vsub.s32 1, %v2009_v30  ;;  %s1905_s9 = scalar_lea.vmem %s1492_s8, 256  ;;  %p1910_p11 = scmp.lt.s32.totalorder %s1492_s8, %s1492_s8 }
 0x164   :  { %p1906_p10 = scmp.ne.s32.totalorder %s1492_s8, %s1905_s9  ;;  %p1911_p12 = scmp.lt.s32.totalorder %s1905_s9, %s1905_s9 }
 0x165   :  { %v874_v6 = vrot.slane %v865_v1, %v873_v2 }
 0x166   :  { %p1912_p13 = por %p1911_p12, %p1910_p11 }
 0x168   :  { %p1913_p0 = pnand %p1912_p13, %p1906_p10 }
 0x16d   :  { %v1806_v7 = vpop.eup %1805 }
 0x16e   :  { %v2035_v8 = vpack.c.bf16 %v1806_v7, %v1806_v7  ;;  %v882_v7 = vrot.slane %v865_v1, %v881_v3 }
 0x170   :  { %1260 = vmatmul.mubr.bf16.vlgmr.msra.gmra.mrb[8].mxu0 %v2035_v8  ;;  %1301 = vmatmul.mubr.bf16.vlgmr.msra.gmra.mrb[8].mxu1 %v2035_v8 }
 0x171   :  { %1310 = vmatpush1.bf16.msra.mxu0 %v1571_v29  ;;  %1351 = vmatpush1.bf16.msra.mxu1 %v1573_v33  ;;  %v839_v29 = vld [vmem:[#allocation7 + $0x130] sm:$0xff]  ;;  %v1595_v33 = vcombine.low %v827_v20, %v831_v21 }
 0x172   :  { %1311 = vmatprep.subr.bf16.mxu0 %v1580_v9  ;;  %1352 = vmatprep.subr.bf16.mxu1 %v1582_v10  ;;  %v1604_v36 = vcombine.high %v835_v28, %v839_v29  ;;  %v1603_v41 = vcombine.low %v835_v28, %v839_v29 }
 0x173   :  { %1341 = vmatprep.mubr.bf16.mxu0 %v1941_v18  ;;  %1382 = vmatprep.mubr.bf16.mxu1 %v1941_v18  ;;  %v1606_v18 = vcombine.high %v836_v31, %v840_v32 }
 0x175   :  { %1312 = vmatpush1.bf16.msra.mxu0 %v1579_v15  ;;  %1353 = vmatpush1.bf16.msra.mxu1 %v1581_v16 }
 0x176   :  { %1313 = vmatprep.subr.bf16.mxu0 %v1588_v17  ;;  %1354 = vmatprep.subr.bf16.mxu1 %v1590_v19 }
 0x179   :  { %1314 = vmatpush1.bf16.msra.mxu0 %v1587_v24  ;;  %1355 = vmatpush1.bf16.msra.mxu1 %v1589_v25 }
 0x17a   :  { %1315 = vmatprep.subr.bf16.mxu0 %v1596_v26  ;;  %1356 = vmatprep.subr.bf16.mxu1 %v1598_v27 }
 0x17d   :  { %1316 = vmatpush1.bf16.msra.mxu0 %v1595_v33  ;;  %1357 = vmatpush1.bf16.msra.mxu1 %v1597_v34  ;;  %v885_v34 = vsub.s32 4, %v2009_v30 }
 0x17e   :  { %1317 = vmatprep.subr.bf16.mxu0 %v1604_v36  ;;  %1358 = vmatprep.subr.bf16.mxu1 %v1606_v18  ;;  %v893_v36 = vsub.s32 6, %v2009_v30  ;;  %v889_v18 = vsub.s32 5, %v2009_v30 }
 0x17f   :  { %v886_v40 = vrot.slane %v865_v1, %v885_v34 }
 0x181   :  { %1318 = vmatpush1.bf16.msra.mxu0 %v1603_v41  ;;  %1359 = vmatpush1.bf16.msra.mxu1 %v1605_v42  ;;  %v894_v41 = vrot.slane %v865_v1, %v893_v36 }
 0x182   :  { %1319 = vmatprep.subr.bf16.mxu0 %v1612_v43  ;;  %1360 = vmatprep.subr.bf16.mxu1 %v1614_v44  ;;  %v890_v43 = vrot.slane %v865_v1, %v889_v18  ;;  %v898_v44 = vrot.slane %v865_v1, %v897_v37 }
 0x185   :  { %1320 = vmatpush1.bf16.msra.mxu0 %v1611_v49  ;;  %1361 = vmatpush1.bf16.msra.mxu1 %v1613_v50 }
 0x186   :  { %1321 = vmatprep.subr.bf16.mxu0 %v1620_v51  ;;  %1362 = vmatprep.subr.bf16.mxu1 %v1622_v52 }
 0x189   :  { %1322 = vmatpush1.bf16.msra.mxu0 %v1619_v57  ;;  %1363 = vmatpush1.bf16.msra.mxu1 %v1621_v58 }
 0x18a   :  { %1323 = vmatprep.subr.bf16.mxu0 %v1628_v59  ;;  %1364 = vmatprep.subr.bf16.mxu1 %v1630_v60 }
 0x18d   :  { %1324 = vmatpush1.bf16.msra.mxu0 %v1627_v61  ;;  %1365 = vmatpush1.bf16.msra.mxu1 %v1629_v62 }
 0x190   :  { %1342 = vmatmul.mubr.bf16.vlgmr.msra.gmra.mrb[12].mxu0 %v2035_v8  ;;  %1383 = vmatmul.mubr.bf16.vlgmr.msra.gmra.mrb[12].mxu1 %v2035_v8 }
 0x243   :  { %v1261_v9 = vpop.f32.mrb[8].mxu0  ;;  %v1302_v10 = vpop.f32.mrb[8].mxu1 }
 0x244   :  { %v1262_v11 = vadd.f32 %v1261_v9, %v870_v4  ;;  %v1303_v8 = vadd.f32 %v1302_v10, %v878_v5  ;;  %v1263_v12 = vpop.f32.mrb[9].mxu0  ;;  %v1304_v13 = vpop.f32.mrb[9].mxu1 }
 0x245   :  { %v1264_v14 = vadd.f32 %v1263_v12, %v874_v6  ;;  %v1305_v15 = vadd.f32 %v1304_v13, %v882_v7  ;;  %v1265_v16 = vpop.f32.mrb[10].mxu0  ;;  %v1306_v17 = vpop.f32.mrb[10].mxu1 }
 0x246   :  { %v1631_v19 = vmul.f32 -1.442695, %v1262_v11  ;;  %v1633_v20 = vmul.f32 -1.442695, %v1303_v8  ;;  %v1266_v21 = vpop.f32.mrb[11].mxu0  ;;  %v1307_v22 = vpop.f32.mrb[11].mxu1 }
 0x247   :  { %v1632_v23 = vmul.f32 -1.442695, %v1264_v14  ;;  %v1634_v24 = vmul.f32 -1.442695, %v1305_v15 }
 0x248   :  { %1807 = vpow2.f32 %v1631_v19 }
 0x249   :  { %1809 = vpow2.f32 %v1633_v20 }
 0x24a   :  { %1811 = vpow2.f32 %v1632_v23 }
 0x24b   :  { %1813 = vpow2.f32 %v1634_v24 }
 0x252   :  { %v1808_v25 = vpop.eup %1807 }
 0x253   :  { %v1810_v26 = vpop.eup %1809  ;;  %v1415_v27 = vadd.f32 1.0, %v1808_v25 }
 0x254   :  { %v1812_v28 = vpop.eup %1811  ;;  %v1417_v29 = vadd.f32 1.0, %v1810_v26 }
 0x255   :  { %v1814_v31 = vpop.eup %1813  ;;  %1815 = vrcp.f32 %v1415_v27  ;;  %v1416_v32 = vadd.f32 1.0, %v1812_v28 }
 0x256   :  { %1817 = vrcp.f32 %v1417_v29  ;;  %v1418_v33 = vadd.f32 1.0, %v1814_v31 }
 0x257   :  { %1819 = vrcp.f32 %v1416_v32 }
 0x258   :  { %1821 = vrcp.f32 %v1418_v33 }
 0x25f   :  { %v1816_v38 = vpop.eup %1815 }
 0x260   :  { %v1818_v39 = vpop.eup %1817 }
 0x261   :  { %v1820_v42 = vpop.eup %1819 }
 0x262   :  { %v1822_v45 = vpop.eup %1821  ;;  %v1447_v46 = vcombine.low %v1816_v38, %v1820_v42 }
 0x263   :  { %v1343_v47 = vpop.f32.mrb[12].mxu0  ;;  %v1384_v48 = vpop.f32.mrb[12].mxu1  ;;  %v1448_v49 = vcombine.low %v1818_v39, %v1822_v45 }
 0x264   :  { %v1344_v50 = vadd.f32 %v1343_v47, %v886_v40  ;;  %v1385_v51 = vadd.f32 %v1384_v48, %v894_v41  ;;  %v1345_v52 = vpop.f32.mrb[13].mxu0  ;;  %v1386_v53 = vpop.f32.mrb[13].mxu1  ;;  %v1455_v54 = vrot.slane %v1447_v46, %v2012_v35 }
 0x265   :  { %v1346_v55 = vadd.f32 %v1345_v52, %v890_v43  ;;  %v1387_v30 = vadd.f32 %v1386_v53, %v898_v44  ;;  %v1347_v56 = vpop.f32.mrb[14].mxu0  ;;  %v1388_v57 = vpop.f32.mrb[14].mxu1  ;;  %v1462_v58 = vrot.slane %v1448_v49, %v2012_v35 }
 0x266   :  { %v1635_v59 = vmul.f32 -1.442695, %v1344_v50  ;;  %v1637_v60 = vmul.f32 -1.442695, %v1385_v51  ;;  %v1348_v61 = vpop.f32.mrb[15].mxu0  ;;  %v1389_v62 = vpop.f32.mrb[15].mxu1 }
 0x267   :  { %v1636_v63 = vmul.f32 -1.442695, %v1346_v55  ;;  %v1638_v0 = vmul.f32 -1.442695, %v1387_v30  ;;  %v1463_v1 = vcombine.low %v1455_v54, %v1462_v58 }
 0x268   :  { %1823 = vpow2.f32 %v1635_v59 }
 0x269   :  { %1825 = vpow2.f32 %v1637_v60  ;;  %1483 = vst [vmem:[#allocation8] sm:$0xff] %v1463_v1 }
 0x26a   :  { %1827 = vpow2.f32 %v1636_v63 }
 0x26b   :  { %1829 = vpow2.f32 %v1638_v0 }
 0x272   :  { %v1824_v2 = vpop.eup %1823 }
 0x273   :  { %v1826_v3 = vpop.eup %1825  ;;  %v1419_v4 = vadd.f32 1.0, %v1824_v2 }
 0x274   :  { %v1828_v5 = vpop.eup %1827  ;;  %v1421_v6 = vadd.f32 1.0, %v1826_v3 }
 0x275   :  { %v1830_v7 = vpop.eup %1829  ;;  %1831 = vrcp.f32 %v1419_v4  ;;  %v1420_v9 = vadd.f32 1.0, %v1828_v5 }
 0x276   :  { %1833 = vrcp.f32 %v1421_v6  ;;  %v1422_v10 = vadd.f32 1.0, %v1830_v7 }
 0x277   :  { %1835 = vrcp.f32 %v1420_v9 }
 0x278   :  { %1837 = vrcp.f32 %v1422_v10 }
 0x27f   :  { %v1832_v11 = vpop.eup %1831 }
 0x280   :  { %v1834_v8 = vpop.eup %1833 }
 0x281   :  { %v1836_v12 = vpop.eup %1835 }
 0x282   :  { %v1838_v13 = vpop.eup %1837  ;;  %v1464_v14 = vcombine.low %v1832_v11, %v1836_v12 }
 0x283   :  { %v1465_v15 = vcombine.low %v1834_v8, %v1838_v13 }
 0x284   :  { %v1472_v16 = vrot.slane %v1464_v14, %v2012_v35 }
 0x285   :  { %v1479_v17 = vrot.slane %v1465_v15, %v2012_v35 }
 0x287   :  { %v1480_v19 = vcombine.low %v1472_v16, %v1479_v17 }
 0x289   :  { %1484 = vst [vmem:[#allocation8 + $0x8] sm:$0xff] %v1480_v19 }
 0x28a   :  { %1916 = shalt.err (!%p1913_p0)
}
 0x28b   :  { %s1917_s12 = scalar_lea.hbm %s2075_s5, 256 }
 0x28c   :  { %p1918_p1 = scmp.ne.s32.totalorder %s2075_s5, %s1917_s12  ;;  %p1921_p2 = scmp.lt.u32.totalorder %s1917_s12, %s2075_s5 }
 0x28e   :  { %p1923_p3 = pnand %p1921_p2, %p1918_p1 }
 0x290   :  { %1926 = shalt.err (!%p1923_p3)
}
 0x291   :  { %1494 = dma.vmem_to_hbm [thread:$0]  %s1492_s8, 256, %s2075_s5, [#allocation4]  }
 0x292   :  { %1931 = dma.done.wait [#allocation4], 256  }
 0x293   :  { %1932 = vsyncadd [#allocation4], 4294967040 }
 0x294   :  { %1498 = vsyncpa [#allocation3], 1 }
 0x295   :  { %1499 = vsyncpa [#allocation6], 1 }
 0x296   :  { %1500 = vsyncpa [#allocation4], 1 }

</bundles_post_ra>
